<compile_context>
chip_gen: v5e
topology: v5e:2x2
jax: 0.10.0
libtpu: 0.0.40
codegen_flags: <defaults>
</compile_context>

<pallas_src>
import functools

import jax
import jax.numpy as jnp
from jax.experimental import pallas as pl
from jax.experimental.pallas import tpu as pltpu


def _pick_lane_tile(hw, max_tile):
    """Pick a lane-tile size (multiple of 128).

    - If the whole spatial extent fits in one tile, use it (rounded up to 128).
    - Otherwise prefer a *large* divisor of hw (>= max_tile/2) so there is no
      ragged tail; else fall back to max_tile and mask the tail in-kernel.
    """
    max_tile = max(128, (max_tile // 128) * 128)
    if hw <= max_tile:
        return ((hw + 127) // 128) * 128
    for t in range(max_tile, max_tile // 2, -128):
        if hw % t == 0:
            return t
    return max_tile


def _east_loss_kernel(fs_ref, ls_ref, lm_ref, fg_ref, lg_ref, out_ref,
                      inter_acc, psum_acc, gsum_acc, sl1_acc,
                      *, hw, lane_tile, tiles_per_chunk, needs_mask):
    """One (batch b, spatial-chunk c, lane-tile j) grid step.

    Per-lane partial sums (accumulated in VMEM scratch, lane-reduced at flush):
      0: sum(f_score * l_score * l_mask)   dice intersection
      1: sum(f_score * l_mask)
      2: sum(l_score * l_mask)
      3: sum(smooth_l1 * l_score)          numerator of the mean
    """
    c = pl.program_id(1)
    j = pl.program_id(2)

    @pl.when(j == 0)
    def _init():
        inter_acc[...] = jnp.zeros_like(inter_acc)
        psum_acc[...] = jnp.zeros_like(psum_acc)
        gsum_acc[...] = jnp.zeros_like(gsum_acc)
        sl1_acc[...] = jnp.zeros_like(sl1_acc)

    fs = fs_ref[0].astype(jnp.float32)        # (1, TS)
    ls = ls_ref[0].astype(jnp.float32)        # (1, TS)
    lm = lm_ref[0].astype(jnp.float32)        # (1, TS)
    fg = fg_ref[0].astype(jnp.float32)        # (8, TS)
    lg = lg_ref[0].astype(jnp.float32)        # (9, TS)
    lg_geo = lg[0:8, :]                       # (8, TS) geo targets
    lg_w = lg[8:9, :]                         # (1, TS) geo weight (l_geo[:, -1])

    # --- dice partial sums (reuse products) ---
    psum = fs * lm
    gsum = ls * lm
    inter = psum * ls

    # --- smooth L1 over the 8 geo channels ---
    #   sum_c (w/8) * in_loss_c * ls, then * ls for the mean numerator
    #   == (w * ls^2 / 8) * sum_c in_loss_c
    abs_diff = jnp.abs(lg_geo - fg)                                       # (8, TS)
    in_loss = jnp.where(abs_diff < ls, abs_diff * abs_diff, abs_diff - 0.5)
    sl1 = (lg_w * ls * ls * 0.125) * jnp.sum(in_loss, axis=0, keepdims=True)

    if needs_mask:
        # Ragged last tile: lanes beyond hw hold undefined data from the
        # partial edge block DMA.  jnp.where (select, not multiply) makes the
        # contribution exactly 0 even if that data is inf/NaN.
        g = c * tiles_per_chunk + j                       # global tile index
        lane = jax.lax.broadcasted_iota(jnp.int32, (1, lane_tile), 1)
        valid = lane < (hw - g * lane_tile)
        inter = jnp.where(valid, inter, 0.0)
        psum = jnp.where(valid, psum, 0.0)
        gsum = jnp.where(valid, gsum, 0.0)
        sl1 = jnp.where(valid, sl1, 0.0)

    inter_acc[...] += inter
    psum_acc[...] += psum
    gsum_acc[...] += gsum
    sl1_acc[...] += sl1

    # Flush: lane-reduce each accumulator once per (b, c) and write a tiny
    # (4, 128) block (scalar broadcast across the 128 lanes -> unmasked store).
    @pl.when(j == pl.num_programs(2) - 1)
    def _flush():
        ones = jnp.ones((1, 128), jnp.float32)
        out_ref[0, 0, 0:1, :] = ones * jnp.sum(inter_acc[...])
        out_ref[0, 0, 1:2, :] = ones * jnp.sum(psum_acc[...])
        out_ref[0, 0, 2:3, :] = ones * jnp.sum(gsum_acc[...])
        out_ref[0, 0, 3:4, :] = ones * jnp.sum(sl1_acc[...])


@functools.partial(
    jax.jit, static_argnames=("eps", "max_lane_tile", "num_spatial_chunks"))
def east_loss(f_score, f_geo, l_score, l_geo, l_mask, eps=1e-6,
              max_lane_tile=32768, num_spatial_chunks=2):
    """JAX/Pallas equivalent of EASTLoss.forward.

    Args (NCHW, any float dtype — upcast to f32 inside the kernel; feed bf16
    directly to halve HBM traffic of this bandwidth-bound kernel):
      f_score: (B, 1, H, W)   predicted score map
      f_geo  : (B, 8, H, W)   predicted geo maps
      l_score: (B, 1, H, W)   label score map
      l_geo  : (B, 9, H, W)   label geo maps (last channel = weight)
      l_mask : (B, 1, H, W)   training mask
    Returns dict with 'loss', 'dice_loss', 'smooth_l1_loss' (scalars, float32).
    """
    B, _, H, W = f_score.shape
    HW = H * W
    TS = _pick_lane_tile(HW, max_lane_tile)
    n_tiles = -(-HW // TS)
    needs_mask = (n_tiles * TS != HW)

    # Spatial "parallel" chunks: only use a chunk count that divides n_tiles
    # exactly (keeps block indexing trivially in-bounds). n_chunks=2 keeps both
    # v7x TensorCores busy at small batch; it is a no-op on v5e/v6e.
    n_chunks = 1
    for c in range(min(num_spatial_chunks, n_tiles), 0, -1):
        if n_tiles % c == 0:
            n_chunks = c
            break
    tiles_per_chunk = n_tiles // n_chunks

    # NCHW -> (B, C, H*W): free, contiguous reshape. No transpose, no pad.
    fs = f_score.reshape(B, 1, HW)
    ls = l_score.reshape(B, 1, HW)
    lm = l_mask.reshape(B, 1, HW)
    fg = f_geo.reshape(B, 8, HW)
    lg = l_geo.reshape(B, 9, HW)

    kernel = functools.partial(
        _east_loss_kernel, hw=HW, lane_tile=TS,
        tiles_per_chunk=tiles_per_chunk, needs_mask=needs_mask)

    lane_map = lambda b, c, j: (b, 0, c * tiles_per_chunk + j)

    acc = pl.pallas_call(
        kernel,
        out_shape=jax.ShapeDtypeStruct((B, n_chunks, 4, 128), jnp.float32),
        grid_spec=pltpu.PrefetchScalarGridSpec(
            num_scalar_prefetch=0,
            grid=(B, n_chunks, tiles_per_chunk),
            in_specs=[
                pl.BlockSpec((1, 1, TS), lane_map),   # f_score
                pl.BlockSpec((1, 1, TS), lane_map),   # l_score
                pl.BlockSpec((1, 1, TS), lane_map),   # l_mask
                pl.BlockSpec((1, 8, TS), lane_map),   # f_geo
                pl.BlockSpec((1, 9, TS), lane_map),   # l_geo (+ weight)
            ],
            out_specs=pl.BlockSpec((1, 1, 4, 128), lambda b, c, j: (b, c, 0, 0)),
            scratch_shapes=[
                pltpu.VMEM((1, TS), jnp.float32),   # dice intersection
                pltpu.VMEM((1, TS), jnp.float32),   # pred * mask
                pltpu.VMEM((1, TS), jnp.float32),   # gt * mask
                pltpu.VMEM((1, TS), jnp.float32),   # smooth L1 numerator
            ],
        ),
        compiler_params=pltpu.CompilerParams(
            dimension_semantics=("parallel", "parallel", "arbitrary"),
            # Explicit limit: > v5e's 16 MiB scoped default, < v7x's 64 MiB
            # physical VMEM. Actual use at TS=32768 is ~15 MiB.
            vmem_limit_bytes=48 * 1024 * 1024,
        ),
    )(fs, ls, lm, fg, lg)

    # Each (b, c, k, :) row holds one scalar broadcast across 128 lanes.
    sums = jnp.sum(acc[:, :, :, 0], axis=(0, 1))                  # (4,)
    intersection, pred_sum, gt_sum, sl1_sum = sums[0], sums[1], sums[2], sums[3]

    union = pred_sum + gt_sum + eps
    dice_loss = (1.0 - 2.0 * intersection / union) * 0.01
    smooth_l1_loss = sl1_sum / jnp.float32(B * H * W)    # mean over (B, 1, H, W)
    total_loss = dice_loss + smooth_l1_loss
    return {
        "loss": total_loss,
        "dice_loss": dice_loss,
        "smooth_l1_loss": smooth_l1_loss,
    }


def _east_loss_reference(f_score, f_geo, l_score, l_geo, l_mask, eps=1e-6):
    """Pure-jnp port of the PyTorch module (for verification)."""
    intersection = jnp.sum(f_score * l_score * l_mask)
    union = jnp.sum(f_score * l_mask) + jnp.sum(l_score * l_mask) + eps
    dice_loss = 1.0 - 2.0 * intersection / union

    channels = 8
    smooth_l1 = 0.0
    for i in range(channels):
        geo_diff = l_geo[:, i : i + 1] - f_geo[:, i : i + 1]
        abs_geo_diff = jnp.abs(geo_diff)
        sign = (abs_geo_diff < l_score).astype(jnp.float32)
        in_loss = abs_geo_diff * abs_geo_diff * sign + (abs_geo_diff - 0.5) * (1.0 - sign)
        out_loss = l_geo[:, -1:] / channels * in_loss * l_score
        smooth_l1 = smooth_l1 + out_loss
    smooth_l1_loss = jnp.mean(smooth_l1 * l_score)
    dice_loss = dice_loss * 0.01
    total = dice_loss + smooth_l1_loss
    return {"loss": total, "dice_loss": dice_loss, "smooth_l1_loss": smooth_l1_loss}


def _make_inputs(key, B, H, W):
    k1, k2, k3, k4, k5 = jax.random.split(key, 5)
    f_score = jax.nn.sigmoid(jax.random.normal(k1, (B, 1, H, W), jnp.float32))
    f_geo = jax.random.normal(k2, (B, 8, H, W), jnp.float32)
    l_score = (jax.random.uniform(k3, (B, 1, H, W)) > 0.5).astype(jnp.float32)
    l_geo = jax.random.normal(k4, (B, 9, H, W), jnp.float32)
    l_mask = (jax.random.uniform(k5, (B, 1, H, W)) > 0.2).astype(jnp.float32)
    return f_score, f_geo, l_score, l_geo, l_mask


def _check(args, **kw):
    losses = east_loss(*args, **kw)
    losses = jax.tree_util.tree_map(jax.block_until_ready, losses)
    ref = _east_loss_reference(*args)
    for name in ("loss", "dice_loss", "smooth_l1_loss"):
        assert jnp.allclose(losses[name], ref[name], rtol=1e-4, atol=1e-5), (
            name, float(losses[name]), float(ref[name]))


if __name__ == "__main__":
    key = jax.random.PRNGKey(0)
    ka, kb, kc = jax.random.split(key, 3)

    # 1) Primary small case: single lane tile, no masking needed.
    _check(_make_inputs(ka, B=2, H=16, W=16))

    # 2) Multi-tile + 2 spatial chunks (forced with a small lane tile) to
    #    exercise accumulate/flush across the reduction axis and the chunk axis.
    _check(_make_inputs(kb, B=1, H=32, W=32), max_lane_tile=128)

    # 3) Ragged spatial extent (H*W not a multiple of 128) to exercise the
    #    in-kernel tail mask path.
    _check(_make_inputs(kc, B=2, H=10, W=13))

    print("KERNEL_OK")
</pallas_src>

<mosaic_0001>
module attributes {stable_mosaic.version = 11 : i64} {
  func.func @_east_loss_kernel(%arg0: i32, %arg1: i32, %arg2: i32, %arg3: memref<1x1x256xf32, #tpu.memory_space<vmem>>, %arg4: memref<1x1x256xf32, #tpu.memory_space<vmem>>, %arg5: memref<1x1x256xf32, #tpu.memory_space<vmem>>, %arg6: memref<1x8x256xf32, #tpu.memory_space<vmem>>, %arg7: memref<1x9x256xf32, #tpu.memory_space<vmem>>, %arg8: memref<1x1x4x128xf32, #tpu.memory_space<vmem>>, %arg9: memref<1x256xf32, #tpu.memory_space<vmem>>, %arg10: memref<1x256xf32, #tpu.memory_space<vmem>>, %arg11: memref<1x256xf32, #tpu.memory_space<vmem>>, %arg12: memref<1x256xf32, #tpu.memory_space<vmem>>) attributes {dimension_semantics = [#tpu.dimension_semantics<parallel>, #tpu.dimension_semantics<parallel>, #tpu.dimension_semantics<arbitrary>], iteration_bounds = array<i64: 2, 1, 1>, scalar_prefetch = 0 : i64, scratch_operands = 4 : i64, tpu.core_type = #tpu.core_type<tc>, window_params = [{transform_indices = @transform_0, window_bounds = array<i64: 1, 1, 256>}, {transform_indices = @transform_1, window_bounds = array<i64: 1, 1, 256>}, {transform_indices = @transform_2, window_bounds = array<i64: 1, 1, 256>}, {transform_indices = @transform_3, window_bounds = array<i64: 1, 8, 256>}, {transform_indices = @transform_4, window_bounds = array<i64: 1, 9, 256>}, {transform_indices = @transform_5, window_bounds = array<i64: 1, 1, 4, 128>}]} {
    %c0_i32 = arith.constant 0 : i32
    %0 = arith.cmpi eq, %arg2, %c0_i32 : i32
    %1 = arith.extui %0 : i1 to i32
    %c0_i32_0 = arith.constant 0 : i32
    %2 = arith.cmpi ne, %1, %c0_i32_0 : i32
    scf.if %2 {
      %cst_35 = arith.constant 0.000000e+00 : f32
      %48 = vector.broadcast %cst_35 : f32 to vector<1x256xf32>
      %c0_36 = arith.constant 0 : index
      %c0_37 = arith.constant 0 : index
      %49 = vector.load %arg9[%c0_36, %c0_37] : memref<1x256xf32, #tpu.memory_space<vmem>>, vector<1x256xf32>
      tpu.vector_store %arg9[%c0_36, %c0_37], %48 {strides = array<i32>} : memref<1x256xf32, #tpu.memory_space<vmem>>, vector<1x256xf32>,
      %cst_38 = arith.constant 0.000000e+00 : f32
      %50 = vector.broadcast %cst_38 : f32 to vector<1x256xf32>
      %c0_39 = arith.constant 0 : index
      %c0_40 = arith.constant 0 : index
      %51 = vector.load %arg10[%c0_39, %c0_40] : memref<1x256xf32, #tpu.memory_space<vmem>>, vector<1x256xf32>
      tpu.vector_store %arg10[%c0_39, %c0_40], %50 {strides = array<i32>} : memref<1x256xf32, #tpu.memory_space<vmem>>, vector<1x256xf32>,
      %cst_41 = arith.constant 0.000000e+00 : f32
      %52 = vector.broadcast %cst_41 : f32 to vector<1x256xf32>
      %c0_42 = arith.constant 0 : index
      %c0_43 = arith.constant 0 : index
      %53 = vector.load %arg11[%c0_42, %c0_43] : memref<1x256xf32, #tpu.memory_space<vmem>>, vector<1x256xf32>
      tpu.vector_store %arg11[%c0_42, %c0_43], %52 {strides = array<i32>} : memref<1x256xf32, #tpu.memory_space<vmem>>, vector<1x256xf32>,
      %cst_44 = arith.constant 0.000000e+00 : f32
      %54 = vector.broadcast %cst_44 : f32 to vector<1x256xf32>
      %c0_45 = arith.constant 0 : index
      %c0_46 = arith.constant 0 : index
      %55 = vector.load %arg12[%c0_45, %c0_46] : memref<1x256xf32, #tpu.memory_space<vmem>>, vector<1x256xf32>
      tpu.vector_store %arg12[%c0_45, %c0_46], %54 {strides = array<i32>} : memref<1x256xf32, #tpu.memory_space<vmem>>, vector<1x256xf32>,
    } else {
    }
    %c0 = arith.constant 0 : index
    %c0_1 = arith.constant 0 : index
    %c0_2 = arith.constant 0 : index
    %3 = vector.load %arg3[%c0, %c0_1, %c0_2] : memref<1x1x256xf32, #tpu.memory_space<vmem>>, vector<1x1x256xf32>
    %4 = vector.shape_cast %3 : vector<1x1x256xf32> to vector<1x256xf32>
    %c0_3 = arith.constant 0 : index
    %c0_4 = arith.constant 0 : index
    %c0_5 = arith.constant 0 : index
    %5 = vector.load %arg4[%c0_3, %c0_4, %c0_5] : memref<1x1x256xf32, #tpu.memory_space<vmem>>, vector<1x1x256xf32>
    %6 = vector.shape_cast %5 : vector<1x1x256xf32> to vector<1x256xf32>
    %c0_6 = arith.constant 0 : index
    %c0_7 = arith.constant 0 : index
    %c0_8 = arith.constant 0 : index
    %7 = vector.load %arg5[%c0_6, %c0_7, %c0_8] : memref<1x1x256xf32, #tpu.memory_space<vmem>>, vector<1x1x256xf32>
    %8 = vector.shape_cast %7 : vector<1x1x256xf32> to vector<1x256xf32>
    %c0_9 = arith.constant 0 : index
    %c0_10 = arith.constant 0 : index
    %c0_11 = arith.constant 0 : index
    %9 = vector.load %arg6[%c0_9, %c0_10, %c0_11] : memref<1x8x256xf32, #tpu.memory_space<vmem>>, vector<1x8x256xf32>
    %10 = vector.shape_cast %9 : vector<1x8x256xf32> to vector<8x256xf32>
    %c0_12 = arith.constant 0 : index
    %c0_13 = arith.constant 0 : index
    %c0_14 = arith.constant 0 : index
    %11 = vector.load %arg7[%c0_12, %c0_13, %c0_14] : memref<1x9x256xf32, #tpu.memory_space<vmem>>, vector<1x9x256xf32>
    %12 = vector.shape_cast %11 : vector<1x9x256xf32> to vector<9x256xf32>
    %13 = vector.extract_strided_slice %12 {offsets = [0, 0], sizes = [8, 256], strides = [1, 1]} : vector<9x256xf32> to vector<8x256xf32>
    %14 = vector.extract_strided_slice %12 {offsets = [8, 0], sizes = [1, 256], strides = [1, 1]} : vector<9x256xf32> to vector<1x256xf32>
    %15 = arith.mulf %4, %8 : vector<1x256xf32>
    %16 = arith.mulf %6, %8 : vector<1x256xf32>
    %17 = arith.mulf %15, %6 : vector<1x256xf32>
    %18 = arith.subf %13, %10 : vector<8x256xf32>
    %19 = math.absf %18 : vector<8x256xf32>
    %20 = vector.broadcast %6 : vector<1x256xf32> to vector<8x256xf32>
    %21 = arith.cmpf olt, %19, %20 : vector<8x256xf32>
    %22 = arith.mulf %19, %19 : vector<8x256xf32>
    %cst = arith.constant 5.000000e-01 : f32
    %23 = vector.broadcast %cst : f32 to vector<8x256xf32>
    %24 = arith.subf %19, %23 : vector<8x256xf32>
    %25 = arith.select %21, %22, %24 : vector<8x256xi1>, vector<8x256xf32>
    %26 = arith.mulf %14, %6 : vector<1x256xf32>
    %27 = arith.mulf %26, %6 : vector<1x256xf32>
    %cst_15 = arith.constant 1.250000e-01 : f32
    %28 = vector.broadcast %cst_15 : f32 to vector<1x256xf32>
    %29 = arith.mulf %27, %28 : vector<1x256xf32>
    %cst_16 = arith.constant dense<0.000000e+00> : vector<256xf32>
    %30 = vector.multi_reduction <add>, %25, %cst_16 [0] : vector<8x256xf32> to vector<256xf32>
    %31 = vector.shape_cast %30 : vector<256xf32> to vector<1x256xf32>
    %32 = arith.mulf %29, %31 : vector<1x256xf32>
    %c0_17 = arith.constant 0 : index
    %c0_18 = arith.constant 0 : index
    %33 = vector.load %arg9[%c0_17, %c0_18] : memref<1x256xf32, #tpu.memory_space<vmem>>, vector<1x256xf32>
    %34 = arith.addf %33, %17 : vector<1x256xf32>
    %c0_19 = arith.constant 0 : index
    %c0_20 = arith.constant 0 : index
    %35 = vector.load %arg9[%c0_19, %c0_20] : memref<1x256xf32, #tpu.memory_space<vmem>>, vector<1x256xf32>
    tpu.vector_store %arg9[%c0_19, %c0_20], %34 {strides = array<i32>} : memref<1x256xf32, #tpu.memory_space<vmem>>, vector<1x256xf32>,
    %c0_21 = arith.constant 0 : index
    %c0_22 = arith.constant 0 : index
    %36 = vector.load %arg10[%c0_21, %c0_22] : memref<1x256xf32, #tpu.memory_space<vmem>>, vector<1x256xf32>
    %37 = arith.addf %36, %15 : vector<1x256xf32>
    %c0_23 = arith.constant 0 : index
    %c0_24 = arith.constant 0 : index
    %38 = vector.load %arg10[%c0_23, %c0_24] : memref<1x256xf32, #tpu.memory_space<vmem>>, vector<1x256xf32>
    tpu.vector_store %arg10[%c0_23, %c0_24], %37 {strides = array<i32>} : memref<1x256xf32, #tpu.memory_space<vmem>>, vector<1x256xf32>,
    %c0_25 = arith.constant 0 : index
    %c0_26 = arith.constant 0 : index
    %39 = vector.load %arg11[%c0_25, %c0_26] : memref<1x256xf32, #tpu.memory_space<vmem>>, vector<1x256xf32>
    %40 = arith.addf %39, %16 : vector<1x256xf32>
    %c0_27 = arith.constant 0 : index
    %c0_28 = arith.constant 0 : index
    %41 = vector.load %arg11[%c0_27, %c0_28] : memref<1x256xf32, #tpu.memory_space<vmem>>, vector<1x256xf32>
    tpu.vector_store %arg11[%c0_27, %c0_28], %40 {strides = array<i32>} : memref<1x256xf32, #tpu.memory_space<vmem>>, vector<1x256xf32>,
    %c0_29 = arith.constant 0 : index
    %c0_30 = arith.constant 0 : index
    %42 = vector.load %arg12[%c0_29, %c0_30] : memref<1x256xf32, #tpu.memory_space<vmem>>, vector<1x256xf32>
    %43 = arith.addf %42, %32 : vector<1x256xf32>
    %c0_31 = arith.constant 0 : index
    %c0_32 = arith.constant 0 : index
    %44 = vector.load %arg12[%c0_31, %c0_32] : memref<1x256xf32, #tpu.memory_space<vmem>>, vector<1x256xf32>
    tpu.vector_store %arg12[%c0_31, %c0_32], %43 {strides = array<i32>} : memref<1x256xf32, #tpu.memory_space<vmem>>, vector<1x256xf32>,
    %c0_i32_33 = arith.constant 0 : i32
    %45 = arith.cmpi eq, %arg2, %c0_i32_33 : i32
    %46 = arith.extui %45 : i1 to i32
    %c0_i32_34 = arith.constant 0 : i32
    %47 = arith.cmpi ne, %46, %c0_i32_34 : i32
    scf.if %47 {
      %cst_35 = arith.constant 1.000000e+00 : f32
      %48 = vector.broadcast %cst_35 : f32 to vector<1x128xf32>
      %c0_36 = arith.constant 0 : index
      %c0_37 = arith.constant 0 : index
      %49 = vector.load %arg9[%c0_36, %c0_37] : memref<1x256xf32, #tpu.memory_space<vmem>>, vector<1x256xf32>
      %50 = vector.shape_cast %49 : vector<1x256xf32> to vector<1x1x256xf32>
      %cst_38 = arith.constant dense<0.000000e+00> : vector<1xf32>
      %51 = vector.multi_reduction <add>, %50, %cst_38 [1, 2] : vector<1x1x256xf32> to vector<1xf32>
      %52 = vector.shape_cast %51 : vector<1xf32> to vector<1x1x1xf32>
      %53 = vector.extract %52[0, 0, 0] : f32 from vector<1x1x1xf32>
      %54 = vector.broadcast %53 : f32 to vector<1x128xf32>
      %55 = arith.mulf %48, %54 : vector<1x128xf32>
      %c0_39 = arith.constant 0 : index
      %c0_40 = arith.constant 0 : index
      %c0_41 = arith.constant 0 : index
      %c0_42 = arith.constant 0 : index
      %56 = vector.load %arg8[%c0_39, %c0_40, %c0_41, %c0_42] : memref<1x1x4x128xf32, #tpu.memory_space<vmem>>, vector<1x1x1x128xf32>
      %57 = vector.shape_cast %56 : vector<1x1x1x128xf32> to vector<1x128xf32>
      %58 = vector.shape_cast %55 : vector<1x128xf32> to vector<1x1x1x128xf32>
      tpu.vector_store %arg8[%c0_39, %c0_40, %c0_41, %c0_42], %58 {strides = array<i32>} : memref<1x1x4x128xf32, #tpu.memory_space<vmem>>, vector<1x1x1x128xf32>,
      %c0_43 = arith.constant 0 : index
      %c0_44 = arith.constant 0 : index
      %59 = vector.load %arg10[%c0_43, %c0_44] : memref<1x256xf32, #tpu.memory_space<vmem>>, vector<1x256xf32>
      %60 = vector.shape_cast %59 : vector<1x256xf32> to vector<1x1x256xf32>
      %cst_45 = arith.constant dense<0.000000e+00> : vector<1xf32>
      %61 = vector.multi_reduction <add>, %60, %cst_45 [1, 2] : vector<1x1x256xf32> to vector<1xf32>
      %62 = vector.shape_cast %61 : vector<1xf32> to vector<1x1x1xf32>
      %63 = vector.extract %62[0, 0, 0] : f32 from vector<1x1x1xf32>
      %64 = vector.broadcast %63 : f32 to vector<1x128xf32>
      %65 = arith.mulf %48, %64 : vector<1x128xf32>
      %c0_46 = arith.constant 0 : index
      %c0_47 = arith.constant 0 : index
      %c1 = arith.constant 1 : index
      %c0_48 = arith.constant 0 : index
      %66 = vector.load %arg8[%c0_46, %c0_47, %c1, %c0_48] : memref<1x1x4x128xf32, #tpu.memory_space<vmem>>, vector<1x1x1x128xf32>
      %67 = vector.shape_cast %66 : vector<1x1x1x128xf32> to vector<1x128xf32>
      %68 = vector.shape_cast %65 : vector<1x128xf32> to vector<1x1x1x128xf32>
      tpu.vector_store %arg8[%c0_46, %c0_47, %c1, %c0_48], %68 {strides = array<i32>} : memref<1x1x4x128xf32, #tpu.memory_space<vmem>>, vector<1x1x1x128xf32>,
      %c0_49 = arith.constant 0 : index
      %c0_50 = arith.constant 0 : index
      %69 = vector.load %arg11[%c0_49, %c0_50] : memref<1x256xf32, #tpu.memory_space<vmem>>, vector<1x256xf32>
      %70 = vector.shape_cast %69 : vector<1x256xf32> to vector<1x1x256xf32>
      %cst_51 = arith.constant dense<0.000000e+00> : vector<1xf32>
      %71 = vector.multi_reduction <add>, %70, %cst_51 [1, 2] : vector<1x1x256xf32> to vector<1xf32>
      %72 = vector.shape_cast %71 : vector<1xf32> to vector<1x1x1xf32>
      %73 = vector.extract %72[0, 0, 0] : f32 from vector<1x1x1xf32>
      %74 = vector.broadcast %73 : f32 to vector<1x128xf32>
      %75 = arith.mulf %48, %74 : vector<1x128xf32>
      %c0_52 = arith.constant 0 : index
      %c0_53 = arith.constant 0 : index
      %c2 = arith.constant 2 : index
      %c0_54 = arith.constant 0 : index
      %76 = vector.load %arg8[%c0_52, %c0_53, %c2, %c0_54] : memref<1x1x4x128xf32, #tpu.memory_space<vmem>>, vector<1x1x1x128xf32>
      %77 = vector.shape_cast %76 : vector<1x1x1x128xf32> to vector<1x128xf32>
      %78 = vector.shape_cast %75 : vector<1x128xf32> to vector<1x1x1x128xf32>
      tpu.vector_store %arg8[%c0_52, %c0_53, %c2, %c0_54], %78 {strides = array<i32>} : memref<1x1x4x128xf32, #tpu.memory_space<vmem>>, vector<1x1x1x128xf32>,
      %c0_55 = arith.constant 0 : index
      %c0_56 = arith.constant 0 : index
      %79 = vector.load %arg12[%c0_55, %c0_56] : memref<1x256xf32, #tpu.memory_space<vmem>>, vector<1x256xf32>
      %80 = vector.shape_cast %79 : vector<1x256xf32> to vector<1x1x256xf32>
      %cst_57 = arith.constant dense<0.000000e+00> : vector<1xf32>
      %81 = vector.multi_reduction <add>, %80, %cst_57 [1, 2] : vector<1x1x256xf32> to vector<1xf32>
      %82 = vector.shape_cast %81 : vector<1xf32> to vector<1x1x1xf32>
      %83 = vector.extract %82[0, 0, 0] : f32 from vector<1x1x1xf32>
      %84 = vector.broadcast %83 : f32 to vector<1x128xf32>
      %85 = arith.mulf %48, %84 : vector<1x128xf32>
      %c0_58 = arith.constant 0 : index
      %c0_59 = arith.constant 0 : index
      %c3 = arith.constant 3 : index
      %c0_60 = arith.constant 0 : index
      %86 = vector.load %arg8[%c0_58, %c0_59, %c3, %c0_60] : memref<1x1x4x128xf32, #tpu.memory_space<vmem>>, vector<1x1x1x128xf32>
      %87 = vector.shape_cast %86 : vector<1x1x1x128xf32> to vector<1x128xf32>
      %88 = vector.shape_cast %85 : vector<1x128xf32> to vector<1x1x1x128xf32>
      tpu.vector_store %arg8[%c0_58, %c0_59, %c3, %c0_60], %88 {strides = array<i32>} : memref<1x1x4x128xf32, #tpu.memory_space<vmem>>, vector<1x1x1x128xf32>,
    } else {
    }
    return
  }
  func.func @transform_0(%arg0: i32, %arg1: i32, %arg2: i32) -> (i32, i32, i32) {
    %c1_i32 = arith.constant 1 : i32
    %0 = arith.muli %arg1, %c1_i32 : i32
    %1 = arith.addi %0, %arg2 : i32
    %c0_i32 = arith.constant 0 : i32
    %c0_i32_0 = arith.constant 0 : i32
    return %arg0, %c0_i32, %1 : i32, i32, i32
  }
  func.func @transform_1(%arg0: i32, %arg1: i32, %arg2: i32) -> (i32, i32, i32) {
    %c1_i32 = arith.constant 1 : i32
    %0 = arith.muli %arg1, %c1_i32 : i32
    %1 = arith.addi %0, %arg2 : i32
    %c0_i32 = arith.constant 0 : i32
    %c0_i32_0 = arith.constant 0 : i32
    return %arg0, %c0_i32, %1 : i32, i32, i32
  }
  func.func @transform_2(%arg0: i32, %arg1: i32, %arg2: i32) -> (i32, i32, i32) {
    %c1_i32 = arith.constant 1 : i32
    %0 = arith.muli %arg1, %c1_i32 : i32
    %1 = arith.addi %0, %arg2 : i32
    %c0_i32 = arith.constant 0 : i32
    %c0_i32_0 = arith.constant 0 : i32
    return %arg0, %c0_i32, %1 : i32, i32, i32
  }
  func.func @transform_3(%arg0: i32, %arg1: i32, %arg2: i32) -> (i32, i32, i32) {
    %c1_i32 = arith.constant 1 : i32
    %0 = arith.muli %arg1, %c1_i32 : i32
    %1 = arith.addi %0, %arg2 : i32
    %c0_i32 = arith.constant 0 : i32
    %c0_i32_0 = arith.constant 0 : i32
    return %arg0, %c0_i32, %1 : i32, i32, i32
  }
  func.func @transform_4(%arg0: i32, %arg1: i32, %arg2: i32) -> (i32, i32, i32) {
    %c1_i32 = arith.constant 1 : i32
    %0 = arith.muli %arg1, %c1_i32 : i32
    %1 = arith.addi %0, %arg2 : i32
    %c0_i32 = arith.constant 0 : i32
    %c0_i32_0 = arith.constant 0 : i32
    return %arg0, %c0_i32, %1 : i32, i32, i32
  }
  func.func @transform_5(%arg0: i32, %arg1: i32, %arg2: i32) -> (i32, i32, i32, i32) {
    %c0_i32 = arith.constant 0 : i32
    %c0_i32_0 = arith.constant 0 : i32
    %c0_i32_1 = arith.constant 0 : i32
    return %arg0, %arg1, %c0_i32, %c0_i32_0 : i32, i32, i32, i32
  }
}

</mosaic_0001>

<bundles_post_ra>
// kernel: east_loss.1
= control target key start
LH: loop header
LB: loop body
LE: loop exit
PB: predicated region body
PF: predicated region fallthrough
CT: control target
= control target key end

     0   :  { %s852_s18 = smov 0   ;;  %s854_s19 = smov 0   ;;  %s932_s0 = inlined_call_operand.vmem [shape: f32[2,1,256], index: 0, kind: input, shape index: {}]   ;;  %s933_s1 = inlined_call_operand.vmem [shape: f32[2,1,256], index: 1, kind: input, shape index: {}]   ;;  %s934_s2 = inlined_call_operand.vmem [shape: f32[2,1,256], index: 2, kind: input, shape index: {}]   ;;  %s935_s3 = inlined_call_operand.vmem [shape: f32[2,8,256], index: 3, kind: input, shape index: {}]   ;;  %s936_s4 = inlined_call_operand.vmem [shape: f32[2,9,256], index: 4, kind: input, shape index: {}]   ;;  %s937_s5 = inlined_call_operand.vmem [shape: f32[2,1,4,128], index: 5, kind: output, shape index: {}]  }
   0x1   :  { %s856_s20 = smov 0  }
   0x2 LB: > { %s34_s21 = sadd.s32 1, %s815_s19  ;;  %p749_p0 = scmp.ge.s32.totalorder %s819_s20, 1  ;;  %s819_s20 = sphi %s856_s20, %s15_s20   ;;  %s815_s19 = sphi %s854_s19, %s941_s19   ;;  %s811_s18 = sphi %s852_s18, %s940_s18  }
   0x3   : > { %p36_p1 = scmp.ge.s32.totalorder %s34_s21, 2  ;;  %p300_p2 = scmp.lt.s32.totalorder %s819_s20, 3 }
   0x5   : > { %s943_s21 = smov (%p36_p1, %s34_s21), 0  ;;  %p301_p3 = pnand %p749_p0, %p300_p2 }
   0x6   : > { %p374_p4 = scmp.lt.s32.totalorder (!%p301_p3), %s811_s18, 1 }
   0x7   : > { %304 = sbr.rel (%p301_p3) target bundleno = 238 (0xee), region = 40 }
   0xc   : > { %v440_v0 = vlaneseq  ;;  %s945_s18 = smov (!%p374_p4, %s811_s18), 1  ;;  %v821_v2 = vmov 0.0   ;;  %vm514_vm3 = vcmask 1040384  }
   0xd   : > { %s750_s22 = sshll.u32 %s945_s18, 1  ;;  %s762_s23 = sshll.u32 %s945_s18, 4 }
   0xe   : > { %vm872_vm0 = vcmp.lt.s32.totalorder %v440_v0, 256  ;;  %s380_s26 = scalar_lea.vmem %s932_s0, %s750_s22  ;;  %s391_s29 = scalar_lea.vmem %s933_s1, %s750_s22 }
   0xf   : > { %444 = vst.msk [vmem:[#allocation2] sm:$0x3] %vm872_vm0, %v821_v2  ;;  %s402_s7 = scalar_lea.vmem %s934_s2, %s750_s22  ;;  %s414_s10 = scalar_lea.vmem %s935_s3, %s762_s23  ;;  %v448_v3 = vld [vmem:[%s380_s26] sm:$0x3] }
  0x10   : > { %445 = vst.msk [vmem:[#allocation3] sm:$0x3] %vm872_vm0, %v821_v2  ;;  %v449_v4 = vld [vmem:[%s391_s29] sm:$0x3]  ;;  %s763_s11 = sshll.u32 %s945_s18, 5  ;;  %v452_v7 = vld [vmem:[%s414_s10 + $0x8] sm:$0xff] }
  0x11   : > { %446 = vst.msk [vmem:[#allocation4] sm:$0x3] %vm872_vm0, %v821_v2  ;;  %v450_v5 = vld [vmem:[%s402_s7] sm:$0x3]  ;;  %s426_s14 = scalar_lea.vmem %s936_s4, %s763_s11  ;;  %v465_v11 = vperm.slane %v449_v4, 0  ;;  %v466_v16 = vperm.slane %v449_v4, 1 }
  0x12   : > { %447 = vst.msk [vmem:[#allocation5] sm:$0x3] %vm872_vm0, %v821_v2  ;;  %v451_v6 = vld [vmem:[%s414_s10] sm:$0xff]  ;;  %v457_v8 = vmul.f32 %v450_v5, %v448_v3  ;;  %v454_v10 = vld [vmem:[%s426_s14 + $0x8] sm:$0xff]  ;;  %v458_v12 = vmul.f32 %v450_v5, %v449_v4  ;;  %v455_v18 = vld [vmem:[%s426_s14 + $0x10] sm:$0x1] }
  0x13   : > { %v453_v9 = vld [vmem:[%s426_s14] sm:$0xff]  ;;  %v461_v15 = vsub.f32 %v454_v10, %v452_v7  ;;  %v456_v19 = vld [vmem:[%s426_s14 + $0x18] sm:$0x1]  ;;  %v477_v31 = vmul.f32 %v465_v11, %v455_v18  ;;  %s757_s15 = sshll.u32 %s945_s18, 2 }
  0x14   : > { %v459_v13 = vmul.f32 %v457_v8, %v449_v4  ;;  %v460_v14 = vsub.f32 %v453_v9, %v451_v6  ;;  %v478_v32 = vmul.f32 %v466_v16, %v456_v19  ;;  %s435_s22 = scalar_lea.vmem %s937_s5, %s757_s15 }
  0x15   : > { %v463_v22 = vand.u32 2147483647, %v461_v15  ;;  %v479_v37 = vmul.f32 %v477_v31, %v465_v11 }
  0x16   : > { %v497_v17 = vld [vmem:[#allocation2] sm:$0x3]  ;;  %v462_v21 = vand.u32 2147483647, %v460_v14  ;;  %v480_v38 = vmul.f32 %v478_v32, %v466_v16 }
  0x17   : > { %v504_v20 = vld [vmem:[#allocation3] sm:$0x3]  ;;  %v498_v23 = vadd.f32 %v497_v17, %v459_v13  ;;  %vm470_vm2 = vcmp.lt.f32.partialorder %v463_v22, %v466_v16  ;;  %v472_v28 = vmul.f32 %v463_v22, %v463_v22  ;;  %v759_v30 = vadd.f32 -0.5, %v463_v22 }
  0x18   : > { %v507_v24 = vld [vmem:[#allocation4] sm:$0x3]  ;;  %v505_v26 = vadd.f32 %v504_v20, %v457_v8  ;;  %vm469_vm1 = vcmp.lt.f32.partialorder %v462_v21, %v465_v11  ;;  %v471_v27 = vmul.f32 %v462_v21, %v462_v21  ;;  %v758_v29 = vadd.f32 -0.5, %v462_v21 }
  0x19   : > { %v508_v25 = vadd.f32 %v507_v24, %v458_v12  ;;  %503 = vst.msk [vmem:[#allocation2] sm:$0x3] %vm872_vm0, %v498_v23  ;;  %v476_v34 = vsel %vm470_vm2, %v472_v28, %v759_v30  ;;  %v481_v47 = vmul.f32 0.125, %v479_v37  ;;  %v482_v48 = vmul.f32 0.125, %v480_v38  ;;  %v510_v9 = vld [vmem:[#allocation5] sm:$0x3] }
  0x1a   : > { %506 = vst.msk [vmem:[#allocation3] sm:$0x3] %vm872_vm0, %v505_v26  ;;  %v475_v33 = vsel %vm469_vm1, %v471_v27, %v758_v29  ;;  %v489_v36 = vrot.slane %v476_v34, 4 }
  0x1b   : > { %509 = vst.msk [vmem:[#allocation4] sm:$0x3] %vm872_vm0, %v508_v25  ;;  %v483_v35 = vrot.slane %v475_v33, 4 }
  0x1c   : > { %v490_v40 = vadd.f32 %v489_v36, %v476_v34 }
  0x1d   : > { %v484_v39 = vadd.f32 %v483_v35, %v475_v33 }
  0x1e   : > { %v491_v43 = vrot.slane %v490_v40, 2 }
  0x1f   : > { %v485_v42 = vrot.slane %v484_v39, 2 }
  0x20   : > { %v522_v41 = vld [vmem:[#allocation2] sm:$0x3]  ;;  %v492_v53 = vadd.f32 %v491_v43, %v490_v40 }
  0x21   : > { %v524_v44 = vperm.slane %v522_v41, 0  ;;  %v525_v45 = vperm.slane %v522_v41, 1  ;;  %v542_v51 = vld [vmem:[#allocation3] sm:$0x3]  ;;  %v486_v52 = vadd.f32 %v485_v42, %v484_v39 }
  0x22   : > { %v562_v46 = vld [vmem:[#allocation4] sm:$0x3]  ;;  %v544_v59 = vperm.slane %v542_v51, 0  ;;  %v493_v61 = vrot.slane %v492_v53, 1  ;;  %v545_v63 = vperm.slane %v542_v51, 1 }
  0x23   : > { %v564_v49 = vperm.slane %v562_v46, 0  ;;  %v565_v50 = vperm.slane %v562_v46, 1  ;;  %v528_v54 = vsel %vm514_vm3, %v524_v44, 0.0  ;;  %v529_v55 = vsel %vm514_vm3, %v525_v45, 0.0 }
  0x24   : > { %v530_v56 = vadd.f32 %v529_v55, %v528_v54  ;;  %v487_v60 = vrot.slane %v486_v52, 1  ;;  %v494_v2 = vadd.f32 %v493_v61, %v492_v53  ;;  %v548_v3 = vsel %vm514_vm3, %v544_v59, 0.0 }
  0x25   : > { %v568_v57 = vsel %vm514_vm3, %v564_v49, 0.0  ;;  %v569_v58 = vsel %vm514_vm3, %v565_v50, 0.0  ;;  %v549_v4 = vsel %vm514_vm3, %v545_v63, 0.0 }
  0x26   : > { %v570_v62 = vadd.f32 %v569_v58, %v568_v57  ;;  %531 = vadd.xlane.f32.xlu0 %v530_v56  ;;  %v488_v0 = vadd.f32 %v487_v60, %v486_v52  ;;  %v496_v6 = vmul.f32 %v494_v2, %v482_v48  ;;  %v550_v7 = vadd.f32 %v549_v4, %v548_v3 }
  0x28   : > { %571 = vadd.xlane.f32.xlu1 %v570_v62  ;;  %v495_v5 = vmul.f32 %v488_v0, %v481_v47  ;;  %v513_v8 = vrot.slane %v496_v6, 7 }
  0x2a   : > { %v515_v10 = vsel %vm514_vm3, %v495_v5, %v513_v8 }
  0x2b   : > { %v517_v11 = vadd.f32 %v515_v10, %v510_v9 }
  0x2d   : > { %518 = vst.msk [vmem:[#allocation5] sm:$0x3] %vm872_vm0, %v517_v11 }
  0x2e   : > { %551 = vadd.xlane.f32.xlu0 %v550_v7 }
  0x34   : > { %v582_v12 = vld [vmem:[#allocation5] sm:$0x3] }
  0x35   : > { %v584_v13 = vperm.slane %v582_v12, 0  ;;  %v585_v14 = vperm.slane %v582_v12, 1 }
  0x37   : > { %v588_v15 = vsel %vm514_vm3, %v584_v13, 0.0  ;;  %v589_v16 = vsel %vm514_vm3, %v585_v14, 0.0 }
  0x38   : > { %v590_v17 = vadd.f32 %v589_v16, %v588_v15 }
  0x3a   : > { %591 = vadd.xlane.f32.xlu1 %v590_v17 }
  0x99   : > { %v532_v18 = vpop.xlane.xlu0 %531 }
  0x9a   : > { %v533_v19 = vrot.slane %v532_v18, 4 }
  0x9b   : > { %v572_v20 = vpop.xlane.xlu1 %571 }
  0x9c   : > { %v573_v21 = vrot.slane %v572_v20, 4  ;;  %v534_v22 = vadd.f32 %v533_v19, %v532_v18 }
  0x9e   : > { %v574_v23 = vadd.f32 %v573_v21, %v572_v20  ;;  %v535_v24 = vrot.slane %v534_v22, 2 }
  0xa0   : > { %v536_v25 = vadd.f32 %v535_v24, %v534_v22  ;;  %v575_v26 = vrot.slane %v574_v23, 2 }
  0xa1   : > { %v552_v1 = vpop.xlane.xlu0 %551 }
  0xa2   : > { %v553_v27 = vrot.slane %v552_v1, 4  ;;  %v537_v28 = vrot.slane %v536_v25, 1  ;;  %v576_v31 = vadd.f32 %v575_v26, %v574_v23 }
  0xa4   : > { %v554_v29 = vadd.f32 %v553_v27, %v552_v1  ;;  %v538_v30 = vadd.f32 %v537_v28, %v536_v25  ;;  %v577_v34 = vrot.slane %v576_v31, 1 }
  0xa6   : > { %v555_v32 = vrot.slane %v554_v29, 2  ;;  %764 = vpush %v538_v30  ;;  %v578_v37 = vadd.f32 %v577_v34, %v576_v31 }
  0xa8   : > { %v556_v33 = vadd.f32 %v555_v32, %v554_v29 }
  0xaa   : > { %v557_v35 = vrot.slane %v556_v33, 1 }
  0xac   : > { %v558_v36 = vadd.f32 %v557_v35, %v556_v33 }
  0xad   : > { %v592_v38 = vpop.xlane.xlu1 %591 }
  0xae   : > { %766 = vpush %v558_v36  ;;  %v593_v39 = vrot.slane %v592_v38, 4 }
  0xaf   : > { %768 = vpush %v578_v37 }
  0xb0   : > { %v594_v40 = vadd.f32 %v593_v39, %v592_v38 }
  0xb2   : > { %v595_v41 = vrot.slane %v594_v40, 2 }
  0xb4   : > { %v596_v42 = vadd.f32 %v595_v41, %v594_v40 }
  0xb6   : > { %v597_v43 = vrot.slane %v596_v42, 1 }
  0xb8   : > { %v598_v44 = vadd.f32 %v597_v43, %v596_v42 }
  0xba   : > { %770 = vpush %v598_v44 }
  0xd7   : > { %s765_s23 = spop %764 }
  0xd8   : > { %v540_v45 = vstv %s765_s23 }
  0xd9   : > { %541 = vst [vmem:[%s435_s22] sm:$0x1] %v540_v45 }
  0xdf   : > { %s767_s24 = spop %766 }
  0xe0   : > { %v560_v46 = vstv %s767_s24  ;;  %s769_s25 = spop %768 }
  0xe1   : > { %561 = vst [vmem:[%s435_s22 + $0x1] sm:$0x1] %v560_v46  ;;  %v580_v47 = vstv %s769_s25 }
  0xe2   : > { %581 = vst [vmem:[%s435_s22 + $0x2] sm:$0x1] %v580_v47 }
  0xeb   : > { %s771_s26 = spop %770 }
  0xec   : > { %v600_v48 = vstv %s771_s26 }
  0xed   : > { %601 = vst [vmem:[%s435_s22 + $0x3] sm:$0x1] %v600_v48 }
  0xee PF: > { %s15_s20 = sadd.s32 1, %s819_s20   ;;  %s940_s18 = smov %s815_s19 }
  0xef   : > { %p12_p5 = scmp.ge.s32.totalorder %s15_s20, 4   ;;  %s941_s19 = smov %s943_s21 }
  0xf1   :  { %14 = sbr.rel (!%p12_p5) target bundleno = 2 (0x2), region = 90 }

</bundles_post_ra>
